<compile_context>
chip_gen: v7x
topology: tpu7x:2x2x1
jax: 0.10.0
libtpu: 0.0.40
codegen_flags: <defaults>
</compile_context>

<pallas_src>
import functools

import jax
import jax.numpy as jnp
from jax.experimental import pallas as pl
from jax.experimental.pallas import tpu as pltpu

_LANE = 128
_SUBLANE = 8
_MAX_COLS = 4096                      # cap for the trailing-factor lane width
_TARGET_BLOCK_BYTES = 4 * 1024 * 1024  # ~4 MiB per input per grid step
_VMEM_LIMIT_BYTES = 48 * 1024 * 1024   # explicit, with headroom (fits v7x 64MiB)


def _round_up(v, m):
    return -(-v // m) * m


def _focal_sum_kernel(x_ref, t_ref, out_ref, *, alpha, gamma, logits,
                      binary_targets, compute_dtype, valid_rows,
                      tiles_per_slice, need_mask):
    """Accumulate per-slice focal-loss partial sums into a resident (8, C) block."""
    i = pl.program_id(1)  # reduction ("arbitrary") axis

    @pl.when(i == 0)
    def _():
        out_ref[...] = jnp.zeros_like(out_ref)

    x = x_ref[...].astype(compute_dtype)
    t = t_ref[...].astype(compute_dtype)
    tile_rows, cols = x.shape

    if need_mask:
        # Row mask for (a) Pallas-garbage rows of a ragged last block and
        # (b) whole duplicate blocks created by the unconditional two-slice
        # split (their index_map is clamped to the last real block).  Built
        # from a cheap (T, 1) iota; garbage lanes (NaN/Inf) are simply
        # discarded by the final select on f_loss, so no input sanitizing.
        c = pl.program_id(0)
        row0 = (c * tiles_per_slice + i) * tile_rows
        row_ids = jax.lax.broadcasted_iota(jnp.int32, (tile_rows, 1), 0) + row0
        row_ok = row_ids < valid_rows

    if logits:
        # stable binary_cross_entropy_with_logits
        bce = jnp.maximum(x, 0.0) - x * t + jnp.log1p(jnp.exp(-jnp.abs(x)))
        pt = jnp.exp(-bce)
    else:
        if binary_targets:
            # Exact for targets in {0, 1} (caller-asserted): one log per
            # element instead of two, and no exp(-bce).
            pt = t * x + (1.0 - t) * (1.0 - x)
            bce = -jnp.maximum(jnp.log(pt), -100.0)  # PyTorch's -100 log clamp
        else:
            # binary_cross_entropy: PyTorch clamps each log term at -100
            log_p = jnp.maximum(jnp.log(x), -100.0)
            log_1mp = jnp.maximum(jnp.log(1.0 - x), -100.0)
            bce = -(t * log_p + (1.0 - t) * log_1mp)
            pt = jnp.exp(-bce)

    # Guard against fp rounding only; differs from PyTorch only for
    # pathological inputs with non-integer gamma (PyTorch would emit NaN).
    one_minus_pt = jnp.maximum(1.0 - pt, 0.0)
    g = float(gamma)
    if g == 0.0:
        focal_w = jnp.ones_like(one_minus_pt)
    elif g == float(int(g)) and 1 <= int(g) <= 8:
        # integer gamma -> repeated multiply on the VPU (no pow -> no exp/log)
        focal_w = one_minus_pt
        for _ in range(int(g) - 1):
            focal_w = focal_w * one_minus_pt
    else:
        focal_w = one_minus_pt ** g

    f_loss = focal_w * bce
    if float(alpha) != 1.0:
        f_loss = f_loss * alpha
    if need_mask:
        f_loss = jnp.where(row_ok, f_loss, 0.0)

    # (T, C) -> (T//8, 8, C) summed over the leading axis: plain vreg adds into
    # the resident (8, C) accumulator (f32); the single cross-lane/sublane
    # reduce and the divide-by-N happen once in the wrapper epilogue.
    fl3 = f_loss.astype(jnp.float32).reshape(tile_rows // _SUBLANE, _SUBLANE, cols)
    out_ref[...] += jnp.sum(fl3, axis=0)


def _pick_columns(shape, n):
    """Zero-copy lane width from trailing-dim factors for lane-ragged sizes."""
    best, best_util = None, 0.0
    p = 1
    for d in reversed(tuple(shape)):
        p *= int(d)
        if p > _MAX_COLS:
            break
        if p < _LANE or (n // p) < _SUBLANE:
            continue
        util = p / float(_round_up(p, _LANE))
        if util >= 0.5 and util > best_util:
            best, best_util = p, util
    return best


def focal_loss(inputs, targets, *, alpha=1.0, gamma=2.0, logits=False,
               reduce=True, binary_targets=False, compute_dtype=jnp.float32,
               max_block_rows=None):
    """Pallas TPU implementation of FocalLoss.forward (mean reduction).

    binary_targets=True assumes targets are exactly {0, 1} (faster, exact for
    binary labels; do not use with soft labels).  compute_dtype=jnp.bfloat16
    runs the elementwise chain in bf16 (accumulation stays f32).
    """
    assert inputs.shape == targets.shape
    if not reduce:
        # TODO(synk): reduce=False returns per-element losses; needs an
        # elementwise-output kernel variant (not wired here).
        raise NotImplementedError("reduce=False not wired to the Pallas kernel")

    n = int(inputs.size)
    x = inputs.reshape(-1)
    t = targets.reshape(-1)

    # ---- choose a copy-free 2D view (rows, cols) of the flat data -----------
    if n % _LANE == 0 and n // _LANE >= _SUBLANE:
        cols, padded = _LANE, n                # lane-dense, zero-copy
    else:
        cols = _pick_columns(inputs.shape, n)  # lane-ragged, still zero-copy
        padded = n
        if cols is None:
            # Tiny / awkward input: pad to an (8*128)-aligned length with
            # values that contribute exactly zero loss for every formulation.
            # TODO(synk): large lane-ragged inputs with no usable trailing
            # factor still incur this one pad copy.
            cols = _LANE
            padded = _round_up(n, _SUBLANE * _LANE)

    if padded != n:
        pad_x = -100.0 if logits else 0.0
        x = jnp.pad(x, (0, padded - n), constant_values=pad_x)
        t = jnp.pad(t, (0, padded - n), constant_values=0.0)

    rows = padded // cols
    x2d = x.reshape(rows, cols)
    t2d = t.reshape(rows, cols)

    # ---- tile geometry -------------------------------------------------------
    lane_tiles = -(-cols // _LANE)
    itemsize = max(x2d.dtype.itemsize, t2d.dtype.itemsize)
    cap_rows = max(_SUBLANE,
                   (_TARGET_BLOCK_BYTES // (lane_tiles * _LANE * itemsize))
                   // _SUBLANE * _SUBLANE)
    tile_rows = min(cap_rows, rows - rows % _SUBLANE)
    if max_block_rows is not None:  # test hook: force multi-tile on small data
        tile_rows = min(tile_rows,
                        max(_SUBLANE, max_block_rows // _SUBLANE * _SUBLANE))

    total_tiles = -(-rows // tile_rows)
    # Unconditional two-slice split so v7x's two TensorCores each take half of
    # the reduction; harmless (sequential) on 1-TC chips.  Overhang / duplicate
    # blocks are clamped in the index_map and zeroed by the in-kernel row mask.
    num_slices = 2 if total_tiles >= 2 else 1
    tiles_per_slice = -(-total_tiles // num_slices)
    need_mask = (num_slices * tiles_per_slice * tile_rows) != rows
    last_block = total_tiles - 1

    kernel = functools.partial(
        _focal_sum_kernel,
        alpha=float(alpha), gamma=float(gamma), logits=bool(logits),
        binary_targets=bool(binary_targets), compute_dtype=compute_dtype,
        valid_rows=int(rows), tiles_per_slice=int(tiles_per_slice),
        need_mask=bool(need_mask))

    def in_map(c, i):
        return (jnp.minimum(c * tiles_per_slice + i, last_block), 0)

    partials = pl.pallas_call(
        kernel,
        out_shape=jax.ShapeDtypeStruct((num_slices * _SUBLANE, cols),
                                       jnp.float32),
        grid_spec=pltpu.PrefetchScalarGridSpec(
            num_scalar_prefetch=0,
            grid=(num_slices, tiles_per_slice),
            in_specs=[
                pl.BlockSpec((tile_rows, cols), in_map),
                pl.BlockSpec((tile_rows, cols), in_map),
            ],
            out_specs=pl.BlockSpec((_SUBLANE, cols), lambda c, i: (c, 0)),
        ),
        compiler_params=pltpu.CompilerParams(
            dimension_semantics=("parallel", "arbitrary"),
            vmem_limit_bytes=_VMEM_LIMIT_BYTES,
        ),
    )(x2d, t2d)

    return (jnp.sum(partials) / jnp.float32(n)).astype(jnp.float32)


# ----------------------------- references / demo ------------------------------

def _ref_prob(x, t, alpha=1.0, gamma=2.0):
    x = x.astype(jnp.float32)
    t = t.astype(jnp.float32)
    log_p = jnp.maximum(jnp.log(x), -100.0)
    log_1mp = jnp.maximum(jnp.log(1.0 - x), -100.0)
    bce = -(t * log_p + (1.0 - t) * log_1mp)
    pt = jnp.exp(-bce)
    return jnp.mean(alpha * (1.0 - pt) ** gamma * bce)


def _ref_logits(x, t, alpha=1.0, gamma=2.0):
    x = x.astype(jnp.float32)
    t = t.astype(jnp.float32)
    bce = jnp.maximum(x, 0.0) - x * t + jnp.log1p(jnp.exp(-jnp.abs(x)))
    pt = jnp.exp(-bce)
    return jnp.mean(alpha * (1.0 - pt) ** gamma * bce)


if __name__ == "__main__":
    key = jax.random.PRNGKey(0)

    def make_probs(k, shape):
        k1, k2 = jax.random.split(k)
        xs = jax.random.uniform(k1, shape, dtype=jnp.float32,
                                minval=1e-4, maxval=1.0 - 1e-4)
        ts = (jax.random.uniform(k2, shape) > 0.5).astype(jnp.float32)
        return xs, ts

    ks = jax.random.split(key, 6)

    # 1) Module-default config on the NCHW shape (single block, no mask).
    x1, t1 = make_probs(ks[0], (2, 4, 16, 16))
    out1 = jax.block_until_ready(focal_loss(x1, t1))
    ref1 = _ref_prob(x1, t1)
    assert jnp.allclose(out1, ref1, rtol=1e-4, atol=1e-7), (out1, ref1)

    # 2) Binary-target fast path (single log per element, no exp(-bce)).
    out2 = jax.block_until_ready(focal_loss(x1, t1, binary_targets=True))
    assert jnp.allclose(out2, ref1, rtol=1e-4, atol=1e-7), (out2, ref1)

    # 3) logits=True path.
    kl1, kl2 = jax.random.split(ks[1])
    xl = jax.random.normal(kl1, (2, 4, 16, 16), dtype=jnp.float32) * 2.0
    tl = (jax.random.uniform(kl2, (2, 4, 16, 16)) > 0.5).astype(jnp.float32)
    out3 = jax.block_until_ready(focal_loss(xl, tl, logits=True))
    ref3 = _ref_logits(xl, tl)
    assert jnp.allclose(out3, ref3, rtol=1e-4, atol=1e-7), (out3, ref3)

    # 4) Forced multi-tile -> unconditional two-slice split (even tile count).
    out4 = jax.block_until_ready(focal_loss(x1, t1, max_block_rows=8))
    assert jnp.allclose(out4, ref1, rtol=1e-4, atol=1e-7), (out4, ref1)

    # 5) Odd tile count + ragged last block: clamped duplicate block + row mask.
    x5, t5 = make_probs(ks[2], (2, 4, 16, 18))
    out5 = jax.block_until_ready(focal_loss(x5, t5, max_block_rows=8))
    ref5 = _ref_prob(x5, t5)
    assert jnp.allclose(out5, ref5, rtol=1e-4, atol=1e-7), (out5, ref5)

    # 6) Lane-ragged element count: zero-copy trailing-factor view (cols=208),
    #    two slices, masked ragged block, binary-target fast path.
    x6, t6 = make_probs(ks[3], (3, 5, 16, 13))
    out6 = jax.block_until_ready(
        focal_loss(x6, t6, max_block_rows=8, binary_targets=True))
    ref6 = _ref_prob(x6, t6)
    assert jnp.allclose(out6, ref6, rtol=1e-4, atol=1e-7), (out6, ref6)

    # 7) Tiny awkward shape -> zero-loss padding fallback.
    x7, t7 = make_probs(ks[4], (7, 11))
    out7 = jax.block_until_ready(focal_loss(x7, t7))
    ref7 = _ref_prob(x7, t7)
    assert jnp.allclose(out7, ref7, rtol=1e-4, atol=1e-7), (out7, ref7)

    # 8) bf16 inputs with the elementwise chain in bf16 (f32 accumulation).
    x8 = x1.astype(jnp.bfloat16)
    t8 = t1.astype(jnp.bfloat16)
    out8 = jax.block_until_ready(
        focal_loss(x8, t8, compute_dtype=jnp.bfloat16))
    assert bool(jnp.isfinite(out8)) and float(out8) > 0.0, out8

    print("KERNEL_OK")
</pallas_src>

<mosaic_0001>
module attributes {stable_mosaic.version = 11 : i64} {
  func.func @_focal_sum_kernel(%arg0: i32, %arg1: i32, %arg2: memref<16x128xf32, #tpu.memory_space<vmem>>, %arg3: memref<16x128xf32, #tpu.memory_space<vmem>>, %arg4: memref<8x128xf32, #tpu.memory_space<vmem>>) attributes {dimension_semantics = [#tpu.dimension_semantics<parallel>, #tpu.dimension_semantics<arbitrary>], iteration_bounds = array<i64: 1, 1>, scalar_prefetch = 0 : i64, scratch_operands = 0 : i64, tpu.core_type = #tpu.core_type<tc>, window_params = [{transform_indices = @transform_0, window_bounds = array<i64: 16, 128>}, {transform_indices = @transform_1, window_bounds = array<i64: 16, 128>}, {transform_indices = @transform_2, window_bounds = array<i64: 8, 128>}]} {
    %c0_i32 = arith.constant 0 : i32
    %0 = arith.cmpi eq, %arg1, %c0_i32 : i32
    %1 = arith.extui %0 : i1 to i32
    %c0_i32_0 = arith.constant 0 : i32
    %2 = arith.cmpi ne, %1, %c0_i32_0 : i32
    scf.if %2 {
      %cst_16 = arith.constant 0.000000e+00 : f32
      %34 = vector.broadcast %cst_16 : f32 to vector<8x128xf32>
      %c0_17 = arith.constant 0 : index
      %c0_18 = arith.constant 0 : index
      %35 = vector.load %arg4[%c0_17, %c0_18] : memref<8x128xf32, #tpu.memory_space<vmem>>, vector<8x128xf32>
      tpu.vector_store %arg4[%c0_17, %c0_18], %34 {strides = array<i32>} : memref<8x128xf32, #tpu.memory_space<vmem>>, vector<8x128xf32>,
    } else {
    }
    %c0 = arith.constant 0 : index
    %c0_1 = arith.constant 0 : index
    %3 = vector.load %arg2[%c0, %c0_1] : memref<16x128xf32, #tpu.memory_space<vmem>>, vector<16x128xf32>
    %c0_2 = arith.constant 0 : index
    %c0_3 = arith.constant 0 : index
    %4 = vector.load %arg3[%c0_2, %c0_3] : memref<16x128xf32, #tpu.memory_space<vmem>>, vector<16x128xf32>
    %5 = math.log %3 : vector<16x128xf32>
    %cst = arith.constant -1.000000e+02 : f32
    %6 = vector.broadcast %cst : f32 to vector<16x128xf32>
    %7 = arith.maximumf %5, %6 : vector<16x128xf32>
    %cst_4 = arith.constant 1.000000e+00 : f32
    %8 = vector.broadcast %cst_4 : f32 to vector<16x128xf32>
    %9 = arith.subf %8, %3 : vector<16x128xf32>
    %10 = math.log %9 : vector<16x128xf32>
    %cst_5 = arith.constant -1.000000e+02 : f32
    %11 = vector.broadcast %cst_5 : f32 to vector<16x128xf32>
    %12 = arith.maximumf %10, %11 : vector<16x128xf32>
    %13 = arith.mulf %4, %7 : vector<16x128xf32>
    %cst_6 = arith.constant 1.000000e+00 : f32
    %14 = vector.broadcast %cst_6 : f32 to vector<16x128xf32>
    %15 = arith.subf %14, %4 : vector<16x128xf32>
    %16 = arith.mulf %15, %12 : vector<16x128xf32>
    %17 = arith.addf %13, %16 : vector<16x128xf32>
    %cst_7 = arith.constant 0.000000e+00 : f32
    %18 = vector.broadcast %cst_7 : f32 to vector<16x128xf32>
    %19 = arith.subf %18, %17 : vector<16x128xf32>
    %cst_8 = arith.constant 0.000000e+00 : f32
    %20 = vector.broadcast %cst_8 : f32 to vector<16x128xf32>
    %21 = arith.subf %20, %19 : vector<16x128xf32>
    %22 = math.exp %21 : vector<16x128xf32>
    %cst_9 = arith.constant 1.000000e+00 : f32
    %23 = vector.broadcast %cst_9 : f32 to vector<16x128xf32>
    %24 = arith.subf %23, %22 : vector<16x128xf32>
    %cst_10 = arith.constant 0.000000e+00 : f32
    %25 = vector.broadcast %cst_10 : f32 to vector<16x128xf32>
    %26 = arith.maximumf %24, %25 : vector<16x128xf32>
    %27 = arith.mulf %26, %26 : vector<16x128xf32>
    %28 = arith.mulf %27, %19 : vector<16x128xf32>
    %29 = vector.shape_cast %28 : vector<16x128xf32> to vector<2x8x128xf32>
    %c0_11 = arith.constant 0 : index
    %c0_12 = arith.constant 0 : index
    %30 = vector.load %arg4[%c0_11, %c0_12] : memref<8x128xf32, #tpu.memory_space<vmem>>, vector<8x128xf32>
    %cst_13 = arith.constant dense<0.000000e+00> : vector<8x128xf32>
    %31 = vector.multi_reduction <add>, %29, %cst_13 [0] : vector<2x8x128xf32> to vector<8x128xf32>
    %32 = arith.addf %30, %31 : vector<8x128xf32>
    %c0_14 = arith.constant 0 : index
    %c0_15 = arith.constant 0 : index
    %33 = vector.load %arg4[%c0_14, %c0_15] : memref<8x128xf32, #tpu.memory_space<vmem>>, vector<8x128xf32>
    tpu.vector_store %arg4[%c0_14, %c0_15], %32 {strides = array<i32>} : memref<8x128xf32, #tpu.memory_space<vmem>>, vector<8x128xf32>,
    return
  }
  func.func @transform_0(%arg0: i32, %arg1: i32) -> (i32, i32) {
    %c1_i32 = arith.constant 1 : i32
    %0 = arith.muli %arg0, %c1_i32 : i32
    %1 = arith.addi %0, %arg1 : i32
    %c0_i32 = arith.constant 0 : i32
    %2 = arith.minsi %1, %c0_i32 : i32
    %c0_i32_0 = arith.constant 0 : i32
    %c0_i32_1 = arith.constant 0 : i32
    return %2, %c0_i32_0 : i32, i32
  }
  func.func @transform_1(%arg0: i32, %arg1: i32) -> (i32, i32) {
    %c1_i32 = arith.constant 1 : i32
    %0 = arith.muli %arg0, %c1_i32 : i32
    %1 = arith.addi %0, %arg1 : i32
    %c0_i32 = arith.constant 0 : i32
    %2 = arith.minsi %1, %c0_i32 : i32
    %c0_i32_0 = arith.constant 0 : i32
    %c0_i32_1 = arith.constant 0 : i32
    return %2, %c0_i32_0 : i32, i32
  }
  func.func @transform_2(%arg0: i32, %arg1: i32) -> (i32, i32) {
    %c0_i32 = arith.constant 0 : i32
    %c0_i32_0 = arith.constant 0 : i32
    return %arg0, %c0_i32 : i32, i32
  }
}

</mosaic_0001>

<bundles_post_ra>
// kernel: tpu_custom_call.1
= control target key start
LH: loop header
LB: loop body
LE: loop exit
PB: predicated region body
PF: predicated region fallthrough
CT: control target
= control target key end

     0   :  { %7 = vsyncpa [#allocation3], 0  ;;  %s277_s0 = inlined_call_operand.hbm [shape: f32[16,128], index: 0, kind: input, shape index: {}]   ;;  %s278_s1 = inlined_call_operand.hbm [shape: f32[16,128], index: 1, kind: input, shape index: {}]   ;;  %s279_s2 = inlined_call_operand.hbm [shape: f32[8,128], index: 2, kind: output, shape index: {}]  }
   0x1   :  { %8 = vsyncpa [#allocation6], 0 }
   0x2   :  { %9 = vsyncpa [#allocation4], 0  ;;  %s221_s9 = smov [#allocation2]   ;;  %s149_s13 = scalar_lea.hbm %s277_s0, 256 }
   0x3   :  { %s21_s10 = sshll.u32 %s221_s9, 4  ;;  %p150_p0 = scmp.ne.s32.totalorder %s277_s0, %s149_s13  ;;  %s22_s10 = int_to_ptr.vmem [resolvable:$true] %s21_s10 }
   0x4   :  { %p153_p1 = scmp.lt.u32.totalorder %s149_s13, %s277_s0 }
   0x6   :  { %p155_p2 = pnand %p153_p1, %p150_p0 }
   0x8   :  { %158 = shalt.err (!%p155_p2)
}
   0x9   :  { %s159_s18 = scalar_lea.vmem %s22_s10, 256  ;;  %p164_p4 = scmp.lt.s32.totalorder %s22_s10, %s22_s10 }
   0xa   :  { %p160_p3 = scmp.ne.s32.totalorder %s22_s10, %s159_s18  ;;  %p165_p5 = scmp.lt.s32.totalorder %s159_s18, %s159_s18 }
   0xc   :  { %p166_p6 = por %p165_p5, %p164_p4 }
   0xe   :  { %p167_p7 = pnand %p166_p6, %p160_p3 }
  0x10   :  { %170 = shalt.err (!%p167_p7)
}
  0x11   :  { %s222_s19 = smov 128   ;;  %s223_s20 = smov 8  }
  0x12   :  { %27 = dma.hbm_to_vmem [thread:$0]  %s277_s0, 256, %s22_s10, [#allocation3], %s222_s19, %s222_s19, %s223_s20  }
  0x13   :  { %s224_s23 = smov [#allocation5]   ;;  %s171_s27 = scalar_lea.hbm %s278_s1, 256 }
  0x14   :  { %s39_s24 = sshll.u32 %s224_s23, 4  ;;  %p172_p8 = scmp.ne.s32.totalorder %s278_s1, %s171_s27  ;;  %s40_s24 = int_to_ptr.vmem [resolvable:$true] %s39_s24 }
  0x15   :  { %p175_p9 = scmp.lt.u32.totalorder %s171_s27, %s278_s1 }
  0x17   :  { %p177_p10 = pnand %p175_p9, %p172_p8 }
  0x19   :  { %180 = shalt.err (!%p177_p10)
}
  0x1a   :  { %s181_s4 = scalar_lea.vmem %s40_s24, 256  ;;  %p186_p12 = scmp.lt.s32.totalorder %s40_s24, %s40_s24 }
  0x1b   :  { %p182_p11 = scmp.ne.s32.totalorder %s40_s24, %s181_s4  ;;  %p187_p13 = scmp.lt.s32.totalorder %s181_s4, %s181_s4 }
  0x1d   :  { %p188_p0 = por %p187_p13, %p186_p12 }
  0x1f   :  { %p189_p1 = pnand %p188_p0, %p182_p11 }
  0x21   :  { %192 = shalt.err (!%p189_p1)
}
  0x22   :  { %45 = dma.hbm_to_vmem [thread:$0]  %s278_s1, 256, %s40_s24, [#allocation6], %s222_s19, %s222_s19, %s223_s20  }
  0x23   :  { %215 = dma.done.wait [#allocation3], 256  }
  0x24   :  { %216 = vsyncadd [#allocation3], 4294967040 }
  0x25   :  { %217 = dma.done.wait [#allocation6], 256  }
  0x26   :  { %218 = vsyncadd [#allocation6], 4294967040  ;;  %v65_v0 = vld [vmem:[#allocation2] sm:$0xff]  ;;  %v66_v1 = vld [vmem:[#allocation2 + $0x8] sm:$0xff]  ;;  %s225_s1 = smov [#allocation7]  }
  0x27   :  { %137 = vlog2.f32 %v65_v0  ;;  %v75_v2 = vsub.f32 1.0, %v65_v0  ;;  %v76_v3 = vsub.f32 1.0, %v66_v1  ;;  %v67_v5 = vld [vmem:[#allocation5] sm:$0xff]  ;;  %v68_v7 = vld [vmem:[#allocation5 + $0x8] sm:$0xff]  ;;  %s117_s6 = sshll.u32 %s225_s1, 4  ;;  %s118_s6 = int_to_ptr.vmem [resolvable:$true] %s117_s6 }
  0x28   :  { %139 = vlog2.f32 %v66_v1  ;;  %v85_v14 = vsub.f32 1.0, %v67_v5  ;;  %v86_v17 = vsub.f32 1.0, %v68_v7  ;;  %s193_s7 = scalar_lea.vmem %s118_s6, 128  ;;  %p198_p3 = scmp.lt.s32.totalorder %s118_s6, %s118_s6 }
  0x29   :  { %141 = vlog2.f32 %v75_v2  ;;  %p194_p2 = scmp.ne.s32.totalorder %s118_s6, %s193_s7  ;;  %p199_p4 = scmp.lt.s32.totalorder %s193_s7, %s193_s7 }
  0x2a   :  { %143 = vlog2.f32 %v76_v3 }
  0x2b   :  { %p200_p5 = por %p199_p4, %p198_p3 }
  0x2d   :  { %p201_p6 = pnand %p200_p5, %p194_p2 }
  0x31   :  { %v138_v4 = vpop.eup %137 }
  0x32   :  { %v140_v6 = vpop.eup %139  ;;  %v70_v8 = vmul.f32 0.6931472, %v138_v4 }
  0x33   :  { %v142_v9 = vpop.eup %141  ;;  %v72_v10 = vmul.f32 0.6931472, %v140_v6 }
  0x34   :  { %v144_v11 = vpop.eup %143  ;;  %v73_v12 = vmax.f32 %v70_v8, -100.0  ;;  %v78_v13 = vmul.f32 0.6931472, %v142_v9 }
  0x35   :  { %v74_v15 = vmax.f32 %v72_v10, -100.0  ;;  %v80_v16 = vmul.f32 0.6931472, %v144_v11 }
  0x36   :  { %v81_v18 = vmax.f32 %v78_v13, -100.0  ;;  %v83_v19 = vmul.f32 %v73_v12, %v67_v5 }
  0x37   :  { %v82_v20 = vmax.f32 %v80_v16, -100.0  ;;  %v84_v21 = vmul.f32 %v74_v15, %v68_v7 }
  0x38   :  { %v87_v22 = vmul.f32 %v85_v14, %v81_v18 }
  0x39   :  { %v88_v23 = vmul.f32 %v86_v17, %v82_v20 }
  0x3a   :  { %v89_v24 = vadd.f32 %v87_v22, %v83_v19 }
  0x3b   :  { %v90_v25 = vadd.f32 %v88_v23, %v84_v21 }
  0x3c   :  { %v91_v26 = vsub.f32 0.0, %v89_v24 }
  0x3d   :  { %v92_v27 = vsub.f32 0.0, %v90_v25 }
  0x3e   :  { %v93_v28 = vsub.f32 0.0, %v91_v26 }
  0x3f   :  { %v94_v29 = vsub.f32 0.0, %v92_v27 }
  0x40   :  { %v95_v30 = vmul.f32 1.442695, %v93_v28 }
  0x41   :  { %v97_v31 = vmul.f32 1.442695, %v94_v29 }
  0x42   :  { %145 = vpow2.f32 %v95_v30 }
  0x43   :  { %147 = vpow2.f32 %v97_v31 }
  0x4c   :  { %v146_v32 = vpop.eup %145 }
  0x4d   :  { %v148_v33 = vpop.eup %147  ;;  %v99_v34 = vsub.f32 1.0, %v146_v32 }
  0x4e   :  { %v100_v35 = vsub.f32 1.0, %v148_v33 }
  0x4f   :  { %v101_v36 = vmax.f32 %v99_v34, 0.0 }
  0x50   :  { %v102_v37 = vmax.f32 %v100_v35, 0.0 }
  0x51   :  { %v103_v38 = vmul.f32 %v101_v36, %v101_v36 }
  0x52   :  { %v104_v39 = vmul.f32 %v102_v37, %v102_v37 }
  0x53   :  { %v105_v40 = vmul.f32 %v103_v38, %v91_v26 }
  0x54   :  { %v106_v41 = vmul.f32 %v104_v39, %v92_v27 }
  0x56   :  { %v108_v42 = vadd.f32 %v106_v41, %v105_v40 }
  0x58   :  { %110 = vst [vmem:[#allocation7] sm:$0xff] %v108_v42 }
  0x59   :  { %204 = shalt.err (!%p201_p6)
}
  0x5a   :  { %s205_s10 = scalar_lea.hbm %s279_s2, 128 }
  0x5b   :  { %p206_p7 = scmp.ne.s32.totalorder %s279_s2, %s205_s10  ;;  %p209_p8 = scmp.lt.u32.totalorder %s205_s10, %s279_s2 }
  0x5d   :  { %p211_p9 = pnand %p209_p8, %p206_p7 }
  0x5f   :  { %214 = shalt.err (!%p211_p9)
}
  0x60   :  { %120 = dma.vmem_to_hbm [thread:$0]  %s118_s6, 128, %s279_s2, [#allocation4]  }
  0x61   :  { %219 = dma.done.wait [#allocation4], 128  }
  0x62   :  { %220 = vsyncadd [#allocation4], 4294967168 }
  0x63   :  { %124 = vsyncpa [#allocation3], 1 }
  0x64   :  { %125 = vsyncpa [#allocation6], 1 }
  0x65   :  { %126 = vsyncpa [#allocation4], 1 }

</bundles_post_ra>
